<compile_context>
chip_gen: v7x
topology: tpu7x:2x2x1
jax: 0.10.0
libtpu: 0.0.40
codegen_flags: <defaults>
</compile_context>

<pallas_src>
import functools

import jax
import jax.numpy as jnp
import numpy as np
from jax.experimental import pallas as pl
from jax.experimental.pallas import tpu as pltpu


def mee_kernel(logits_ref, targets_ref, out_ref, *, gamma, ea_reg):
    # logits_ref : (C, B, tT)  -- class dim unrolled below; batch on sublanes, time on lanes
    # targets_ref: (B, tT)
    # out_ref    : (1, tT)     -- per-timepoint loss (lane-dense), summed outside the kernel
    C = logits_ref.shape[0]

    tgt = targets_ref[...].astype(jnp.float32)                 # (B, tT)
    valid = tgt > -jnp.inf                                     # "unpad" mask
    validf = valid.astype(jnp.float32)
    n_valid = jnp.sum(validf, axis=0, keepdims=True)           # (1, tT) sublane reduction

    # ---- per-class (B, tT) slabs, all full-lane-width VPU work ----
    lg = [jnp.where(valid, logits_ref[c].astype(jnp.float32), 0.0) for c in range(C)]
    onehot = [(tgt == float(c)).astype(jnp.float32) for c in range(C)]

    # Balanced per-timepoint class weights, gathered per row via the one-hot slabs.
    # The divides here are (1, tT)-shaped (B× cheaper than the main slabs) -> keep exact.
    wc = jnp.zeros_like(tgt)
    for c in range(C):
        cnt = jnp.sum(onehot[c], axis=0, keepdims=True)        # (1, tT)
        w_c = jnp.where(cnt > 0.0, n_valid / (C * jnp.maximum(cnt, 1.0)), 0.0)
        wc = wc + onehot[c] * w_c

    # Softmax expected-class index without materializing p:
    #   expected = (sum_c e_c * dist_c) * 1/(sum_c e_c);   argmax(p) == argmax(e).
    # One exp per class (EUP) and one approx reciprocal (EUP) per element.
    m = lg[0]
    for c in range(1, C):
        m = jnp.maximum(m, lg[c])
    e = [jnp.exp(lg[c] - m) for c in range(C)]
    s = e[0]
    for c in range(1, C):
        s = s + e[c]
    dist = [0.0] + [float(c) + gamma for c in range(1, C)]     # g(arange(C), gamma)
    num = jnp.zeros_like(tgt)
    for c in range(1, C):
        num = num + e[c] * dist[c]
    expected = num * pl.reciprocal(s, approx=True)             # (B, tT); ~2^-12 rel err

    # g() applied to labels
    tgt_safe = jnp.where(valid, tgt, 0.0)
    tgt_g = jnp.where(tgt_safe != 0.0, tgt_safe + gamma, tgt_safe)
    inner = (expected - tgt_g) ** 2

    if ea_reg:
        # exp_arg regularizer: ((p @ dist - argmax(p)) * 1/(C-1))^2 ; argmax(p) == argmax(e).
        # Strict '>' keeps torch's first-index tie-breaking.
        best = e[0]
        arg = jnp.zeros_like(tgt)
        for c in range(1, C):
            take = e[c] > best
            arg = jnp.where(take, float(c), arg)
            best = jnp.maximum(best, e[c])
        inv_c1 = 1.0 / (C - 1)                                 # constant multiply, not a divide
        inner = inner + ((expected - arg) * inv_c1) ** 2

    # per-timepoint loss = mean(wc) * mean(inner) over valid rows
    # (matches torch's (N,1)*(N,) outer-product broadcast followed by mean over N*N).
    sum_wc = jnp.sum(wc, axis=0, keepdims=True)                # wc already 0 on padded rows
    sum_inner = jnp.sum(inner * validf, axis=0, keepdims=True)
    inv_n = jnp.where(n_valid > 0.0, 1.0 / n_valid, 0.0)       # empty timepoints contribute 0
    out_ref[...] = sum_wc * sum_inner * inv_n * inv_n          # (1, tT)


def _round_up(x, m):
    return ((x + m - 1) // m) * m


@functools.partial(jax.jit, static_argnames=("gamma", "ea_reg", "t_tile"))
def mee_loss(logits_btc, targets_bt, gamma=0.0, ea_reg=False, t_tile=512):
    """MEE loss. logits_btc: (B, T, C); targets_bt: (B, T) with -inf padding. Returns scalar."""
    B, T, C = logits_btc.shape

    # Single re-layout to the kernel layout: class-major, batch on the 8-sublane axis, time on
    # the 128-lane axis.  Pure layout plumbing (XLA fuses transpose+pad into one copy); callers
    # that can produce (C, B, T) / (B, T) upstream should skip it entirely.
    logits_cbt = jnp.transpose(logits_btc, (2, 0, 1))
    targets = targets_bt

    if T <= t_tile:
        # Whole (padded) T in a single grid step; block = full array dims (allowed by the
        # full-dim rule even when T is not a multiple of 128).
        tt, num_tiles, t_pad = T, 1, T
    else:
        # Lane-axis tiles must be multiples of 128; pad T up to a whole number of tiles.
        tt = _round_up(min(t_tile, T), 128)
        num_tiles = pl.cdiv(T, tt)
        t_pad = num_tiles * tt
        logits_cbt = jnp.pad(logits_cbt, ((0, 0), (0, 0), (0, t_pad - T)))
        targets = jnp.pad(targets, ((0, 0), (0, t_pad - T)), constant_values=float("-inf"))

    # VMEM footprint per step ~ 2 bufs * (C+1)*B*tt*4 B — at the default tt=512 this stays far
    # below the 32 MiB scoped budget even for B in the thousands; no vmem_limit override needed.
    per_t = pl.pallas_call(
        functools.partial(mee_kernel, gamma=float(gamma), ea_reg=bool(ea_reg)),
        out_shape=jax.ShapeDtypeStruct((1, t_pad), jnp.float32),
        grid=(num_tiles,),
        in_specs=[
            pl.BlockSpec((C, B, tt), lambda i: (0, 0, i)),
            pl.BlockSpec((B, tt), lambda i: (0, i)),
        ],
        out_specs=pl.BlockSpec((1, tt), lambda i: (0, i)),
        compiler_params=pltpu.CompilerParams(
            # Per-tile partial outputs -> no cross-step dependence -> fully parallel
            # (megacore-splittable on v7x).
            dimension_semantics=("parallel",),
        ),
    )(logits_cbt, targets)

    # Mean over the original number of timepoints (padded columns are exact zeros).
    return jnp.sum(per_t) / T


def mee_reference(logits, targets, gamma=0.0, ea_reg=False, classes=(0, 1, 2)):
    """Pure-numpy replica of the PyTorch MEE forward (float64, for verification)."""
    logits = np.asarray(logits, np.float64)
    targets = np.asarray(targets, np.float64)
    B, T, C = logits.shape
    loss = 0.0
    for t in range(T):
        mask = targets[:, t] > -np.inf
        y = targets[mask, t]
        lt = logits[mask, t, :]
        counts = np.array([(y == c).sum() for c in classes], np.float64)
        with np.errstate(divide="ignore"):
            weights = counts.sum() / (len(classes) * counts)   # inf for absent classes (never gathered)
        wc = weights[y.astype(int)][:, None]                   # (N, 1)
        e = np.exp(lt - lt.max(axis=1, keepdims=True))
        p = e / e.sum(axis=1, keepdims=True)
        idx = np.arange(C, dtype=np.float64)
        dist = np.where(idx != 0, idx + gamma, idx)            # g(arange(C), gamma)
        y_g = np.where(y != 0, y + gamma, y)                   # g(targets_t, gamma)
        expected = p @ dist
        inner = (expected - y_g) ** 2
        if ea_reg:
            arg = np.argmax(p, axis=1).astype(np.float64)
            inner = inner + ((expected - arg) / (C - 1)) ** 2
        loss_t = wc * inner                                    # (N,1)*(N,) -> (N,N), as in torch
        loss += loss_t.mean()
    return loss / T


if __name__ == "__main__":
    # MEE has no learnable parameters; hyperparameters set here deterministically.
    B, T, C = 8, 10, 3
    gamma = 1.0   # g() on torch.arange (int) in exp_arg requires integer-valued gamma
    ea_reg = True

    key = jax.random.PRNGKey(0)
    k1, k2 = jax.random.split(key)
    logits = jax.random.normal(k1, (B, T, C), dtype=jnp.float32)
    targets = jax.random.randint(k2, (B, T), 0, C).astype(jnp.float32)

    # Emulate pad_sequence(-inf) ragged batches: last two sequences end two steps early.
    neg_inf = jnp.float32(-jnp.inf)
    targets = targets.at[B - 2:, T - 2:].set(neg_inf)
    logits = logits.at[B - 2:, T - 2:, :].set(neg_inf)

    # Tolerances account for the approx (EUP) reciprocal in the softmax denominator (~2^-12 rel).
    RTOL, ATOL = 1e-3, 1e-5

    # ea_reg + gamma configuration (single-block path: T <= t_tile)
    loss = jax.block_until_ready(mee_loss(logits, targets, gamma=gamma, ea_reg=ea_reg))
    ref = mee_reference(np.array(logits), np.array(targets), gamma=gamma, ea_reg=ea_reg)
    assert np.allclose(float(loss), float(ref), rtol=RTOL, atol=ATOL), (float(loss), float(ref))

    # default configuration (gamma=0, no regularizer)
    loss0 = jax.block_until_ready(mee_loss(logits, targets, gamma=0.0, ea_reg=False))
    ref0 = mee_reference(np.array(logits), np.array(targets), gamma=0.0, ea_reg=False)
    assert np.allclose(float(loss0), float(ref0), rtol=RTOL, atol=ATOL), (float(loss0), float(ref0))

    # exercise the tiled/padded path (forces tt=128 with T-padding masked to -inf)
    loss_p = jax.block_until_ready(mee_loss(logits, targets, gamma=gamma, ea_reg=ea_reg, t_tile=4))
    assert np.allclose(float(loss_p), float(ref), rtol=RTOL, atol=ATOL), (float(loss_p), float(ref))

    print("KERNEL_OK")
</pallas_src>

<mosaic_0001>
module attributes {stable_mosaic.version = 11 : i64} {
  func.func @mee_kernel(%arg0: i32, %arg1: memref<3x8x10xf32, #tpu.memory_space<vmem>>, %arg2: memref<8x10xf32, #tpu.memory_space<vmem>>, %arg3: memref<1x10xf32, #tpu.memory_space<vmem>>) attributes {dimension_semantics = [#tpu.dimension_semantics<parallel>], iteration_bounds = array<i64: 1>, scalar_prefetch = 0 : i64, scratch_operands = 0 : i64, tpu.core_type = #tpu.core_type<tc>, window_params = [{transform_indices = @transform_0, window_bounds = array<i64: 3, 8, 10>}, {transform_indices = @transform_1, window_bounds = array<i64: 8, 10>}, {transform_indices = @transform_2, window_bounds = array<i64: 1, 10>}]} {
    %c0 = arith.constant 0 : index
    %c0_0 = arith.constant 0 : index
    %0 = vector.load %arg2[%c0, %c0_0] : memref<8x10xf32, #tpu.memory_space<vmem>>, vector<8x10xf32>
    %cst = arith.constant 0xFF800000 : f32
    %1 = vector.broadcast %cst : f32 to vector<8x10xf32>
    %2 = arith.cmpf ogt, %0, %1 : vector<8x10xf32>
    %3 = arith.extui %2 : vector<8x10xi1> to vector<8x10xi32>
    %4 = arith.sitofp %3 : vector<8x10xi32> to vector<8x10xf32>
    %cst_1 = arith.constant dense<0.000000e+00> : vector<10xf32>
    %5 = vector.multi_reduction <add>, %4, %cst_1 [0] : vector<8x10xf32> to vector<10xf32>
    %6 = vector.shape_cast %5 : vector<10xf32> to vector<1x10xf32>
    %c0_2 = arith.constant 0 : index
    %c0_3 = arith.constant 0 : index
    %c0_4 = arith.constant 0 : index
    %7 = vector.load %arg1[%c0_2, %c0_3, %c0_4] : memref<3x8x10xf32, #tpu.memory_space<vmem>>, vector<1x8x10xf32>
    %8 = vector.shape_cast %7 : vector<1x8x10xf32> to vector<8x10xf32>
    %cst_5 = arith.constant 0.000000e+00 : f32
    %9 = vector.broadcast %cst_5 : f32 to vector<8x10xf32>
    %10 = arith.select %2, %8, %9 : vector<8x10xi1>, vector<8x10xf32>
    %c1 = arith.constant 1 : index
    %c0_6 = arith.constant 0 : index
    %c0_7 = arith.constant 0 : index
    %11 = vector.load %arg1[%c1, %c0_6, %c0_7] : memref<3x8x10xf32, #tpu.memory_space<vmem>>, vector<1x8x10xf32>
    %12 = vector.shape_cast %11 : vector<1x8x10xf32> to vector<8x10xf32>
    %cst_8 = arith.constant 0.000000e+00 : f32
    %13 = vector.broadcast %cst_8 : f32 to vector<8x10xf32>
    %14 = arith.select %2, %12, %13 : vector<8x10xi1>, vector<8x10xf32>
    %c2 = arith.constant 2 : index
    %c0_9 = arith.constant 0 : index
    %c0_10 = arith.constant 0 : index
    %15 = vector.load %arg1[%c2, %c0_9, %c0_10] : memref<3x8x10xf32, #tpu.memory_space<vmem>>, vector<1x8x10xf32>
    %16 = vector.shape_cast %15 : vector<1x8x10xf32> to vector<8x10xf32>
    %cst_11 = arith.constant 0.000000e+00 : f32
    %17 = vector.broadcast %cst_11 : f32 to vector<8x10xf32>
    %18 = arith.select %2, %16, %17 : vector<8x10xi1>, vector<8x10xf32>
    %cst_12 = arith.constant 0.000000e+00 : f32
    %19 = vector.broadcast %cst_12 : f32 to vector<8x10xf32>
    %20 = arith.cmpf oeq, %0, %19 : vector<8x10xf32>
    %21 = arith.extui %20 : vector<8x10xi1> to vector<8x10xi32>
    %22 = arith.sitofp %21 : vector<8x10xi32> to vector<8x10xf32>
    %cst_13 = arith.constant 1.000000e+00 : f32
    %23 = vector.broadcast %cst_13 : f32 to vector<8x10xf32>
    %24 = arith.cmpf oeq, %0, %23 : vector<8x10xf32>
    %25 = arith.extui %24 : vector<8x10xi1> to vector<8x10xi32>
    %26 = arith.sitofp %25 : vector<8x10xi32> to vector<8x10xf32>
    %cst_14 = arith.constant 2.000000e+00 : f32
    %27 = vector.broadcast %cst_14 : f32 to vector<8x10xf32>
    %28 = arith.cmpf oeq, %0, %27 : vector<8x10xf32>
    %29 = arith.extui %28 : vector<8x10xi1> to vector<8x10xi32>
    %30 = arith.sitofp %29 : vector<8x10xi32> to vector<8x10xf32>
    %cst_15 = arith.constant 0.000000e+00 : f32
    %31 = vector.broadcast %cst_15 : f32 to vector<8x10xf32>
    %cst_16 = arith.constant dense<0.000000e+00> : vector<10xf32>
    %32 = vector.multi_reduction <add>, %22, %cst_16 [0] : vector<8x10xf32> to vector<10xf32>
    %33 = vector.shape_cast %32 : vector<10xf32> to vector<1x10xf32>
    %cst_17 = arith.constant 0.000000e+00 : f32
    %34 = vector.broadcast %cst_17 : f32 to vector<1x10xf32>
    %35 = arith.cmpf ogt, %33, %34 : vector<1x10xf32>
    %cst_18 = arith.constant 1.000000e+00 : f32
    %36 = vector.broadcast %cst_18 : f32 to vector<1x10xf32>
    %37 = arith.maximumf %33, %36 : vector<1x10xf32>
    %cst_19 = arith.constant 3.000000e+00 : f32
    %38 = vector.broadcast %cst_19 : f32 to vector<1x10xf32>
    %39 = arith.mulf %38, %37 : vector<1x10xf32>
    %40 = arith.divf %6, %39 : vector<1x10xf32>
    %cst_20 = arith.constant 0.000000e+00 : f32
    %41 = vector.broadcast %cst_20 : f32 to vector<1x10xf32>
    %42 = arith.select %35, %40, %41 : vector<1x10xi1>, vector<1x10xf32>
    %43 = vector.broadcast %42 : vector<1x10xf32> to vector<8x10xf32>
    %44 = arith.mulf %22, %43 : vector<8x10xf32>
    %45 = arith.addf %31, %44 : vector<8x10xf32>
    %cst_21 = arith.constant dense<0.000000e+00> : vector<10xf32>
    %46 = vector.multi_reduction <add>, %26, %cst_21 [0] : vector<8x10xf32> to vector<10xf32>
    %47 = vector.shape_cast %46 : vector<10xf32> to vector<1x10xf32>
    %cst_22 = arith.constant 0.000000e+00 : f32
    %48 = vector.broadcast %cst_22 : f32 to vector<1x10xf32>
    %49 = arith.cmpf ogt, %47, %48 : vector<1x10xf32>
    %cst_23 = arith.constant 1.000000e+00 : f32
    %50 = vector.broadcast %cst_23 : f32 to vector<1x10xf32>
    %51 = arith.maximumf %47, %50 : vector<1x10xf32>
    %cst_24 = arith.constant 3.000000e+00 : f32
    %52 = vector.broadcast %cst_24 : f32 to vector<1x10xf32>
    %53 = arith.mulf %52, %51 : vector<1x10xf32>
    %54 = arith.divf %6, %53 : vector<1x10xf32>
    %cst_25 = arith.constant 0.000000e+00 : f32
    %55 = vector.broadcast %cst_25 : f32 to vector<1x10xf32>
    %56 = arith.select %49, %54, %55 : vector<1x10xi1>, vector<1x10xf32>
    %57 = vector.broadcast %56 : vector<1x10xf32> to vector<8x10xf32>
    %58 = arith.mulf %26, %57 : vector<8x10xf32>
    %59 = arith.addf %45, %58 : vector<8x10xf32>
    %cst_26 = arith.constant dense<0.000000e+00> : vector<10xf32>
    %60 = vector.multi_reduction <add>, %30, %cst_26 [0] : vector<8x10xf32> to vector<10xf32>
    %61 = vector.shape_cast %60 : vector<10xf32> to vector<1x10xf32>
    %cst_27 = arith.constant 0.000000e+00 : f32
    %62 = vector.broadcast %cst_27 : f32 to vector<1x10xf32>
    %63 = arith.cmpf ogt, %61, %62 : vector<1x10xf32>
    %cst_28 = arith.constant 1.000000e+00 : f32
    %64 = vector.broadcast %cst_28 : f32 to vector<1x10xf32>
    %65 = arith.maximumf %61, %64 : vector<1x10xf32>
    %cst_29 = arith.constant 3.000000e+00 : f32
    %66 = vector.broadcast %cst_29 : f32 to vector<1x10xf32>
    %67 = arith.mulf %66, %65 : vector<1x10xf32>
    %68 = arith.divf %6, %67 : vector<1x10xf32>
    %cst_30 = arith.constant 0.000000e+00 : f32
    %69 = vector.broadcast %cst_30 : f32 to vector<1x10xf32>
    %70 = arith.select %63, %68, %69 : vector<1x10xi1>, vector<1x10xf32>
    %71 = vector.broadcast %70 : vector<1x10xf32> to vector<8x10xf32>
    %72 = arith.mulf %30, %71 : vector<8x10xf32>
    %73 = arith.addf %59, %72 : vector<8x10xf32>
    %74 = arith.maximumf %10, %14 : vector<8x10xf32>
    %75 = arith.maximumf %74, %18 : vector<8x10xf32>
    %76 = arith.subf %10, %75 : vector<8x10xf32>
    %77 = math.exp %76 : vector<8x10xf32>
    %78 = arith.subf %14, %75 : vector<8x10xf32>
    %79 = math.exp %78 : vector<8x10xf32>
    %80 = arith.subf %18, %75 : vector<8x10xf32>
    %81 = math.exp %80 : vector<8x10xf32>
    %82 = arith.addf %77, %79 : vector<8x10xf32>
    %83 = arith.addf %82, %81 : vector<8x10xf32>
    %cst_31 = arith.constant 0.000000e+00 : f32
    %84 = vector.broadcast %cst_31 : f32 to vector<8x10xf32>
    %cst_32 = arith.constant 2.000000e+00 : f32
    %85 = vector.broadcast %cst_32 : f32 to vector<8x10xf32>
    %86 = arith.mulf %79, %85 : vector<8x10xf32>
    %87 = arith.addf %84, %86 : vector<8x10xf32>
    %cst_33 = arith.constant 3.000000e+00 : f32
    %88 = vector.broadcast %cst_33 : f32 to vector<8x10xf32>
    %89 = arith.mulf %81, %88 : vector<8x10xf32>
    %90 = arith.addf %87, %89 : vector<8x10xf32>
    %91 = tpu.reciprocal %83 {approx = true} : vector<8x10xf32> -> vector<8x10xf32>
    %92 = arith.mulf %90, %91 : vector<8x10xf32>
    %cst_34 = arith.constant 0.000000e+00 : f32
    %93 = vector.broadcast %cst_34 : f32 to vector<8x10xf32>
    %94 = arith.select %2, %0, %93 : vector<8x10xi1>, vector<8x10xf32>
    %cst_35 = arith.constant 0.000000e+00 : f32
    %95 = vector.broadcast %cst_35 : f32 to vector<8x10xf32>
    %96 = arith.cmpf one, %94, %95 : vector<8x10xf32>
    %cst_36 = arith.constant 1.000000e+00 : f32
    %97 = vector.broadcast %cst_36 : f32 to vector<8x10xf32>
    %98 = arith.addf %94, %97 : vector<8x10xf32>
    %99 = arith.select %96, %98, %94 : vector<8x10xi1>, vector<8x10xf32>
    %100 = arith.subf %92, %99 : vector<8x10xf32>
    %101 = arith.mulf %100, %100 : vector<8x10xf32>
    %cst_37 = arith.constant 0.000000e+00 : f32
    %102 = vector.broadcast %cst_37 : f32 to vector<8x10xf32>
    %103 = arith.cmpf ogt, %79, %77 : vector<8x10xf32>
    %cst_38 = arith.constant 1.000000e+00 : f32
    %104 = vector.broadcast %cst_38 : f32 to vector<8x10xf32>
    %105 = arith.select %103, %104, %102 : vector<8x10xi1>, vector<8x10xf32>
    %106 = arith.maximumf %77, %79 : vector<8x10xf32>
    %107 = arith.cmpf ogt, %81, %106 : vector<8x10xf32>
    %cst_39 = arith.constant 2.000000e+00 : f32
    %108 = vector.broadcast %cst_39 : f32 to vector<8x10xf32>
    %109 = arith.select %107, %108, %105 : vector<8x10xi1>, vector<8x10xf32>
    %110 = arith.subf %92, %109 : vector<8x10xf32>
    %cst_40 = arith.constant 5.000000e-01 : f32
    %111 = vector.broadcast %cst_40 : f32 to vector<8x10xf32>
    %112 = arith.mulf %110, %111 : vector<8x10xf32>
    %113 = arith.mulf %112, %112 : vector<8x10xf32>
    %114 = arith.addf %101, %113 : vector<8x10xf32>
    %cst_41 = arith.constant dense<0.000000e+00> : vector<10xf32>
    %115 = vector.multi_reduction <add>, %73, %cst_41 [0] : vector<8x10xf32> to vector<10xf32>
    %116 = vector.shape_cast %115 : vector<10xf32> to vector<1x10xf32>
    %117 = arith.mulf %114, %4 : vector<8x10xf32>
    %cst_42 = arith.constant dense<0.000000e+00> : vector<10xf32>
    %118 = vector.multi_reduction <add>, %117, %cst_42 [0] : vector<8x10xf32> to vector<10xf32>
    %119 = vector.shape_cast %118 : vector<10xf32> to vector<1x10xf32>
    %cst_43 = arith.constant 0.000000e+00 : f32
    %120 = vector.broadcast %cst_43 : f32 to vector<1x10xf32>
    %121 = arith.cmpf ogt, %6, %120 : vector<1x10xf32>
    %cst_44 = arith.constant 1.000000e+00 : f32
    %122 = vector.broadcast %cst_44 : f32 to vector<1x10xf32>
    %123 = arith.divf %122, %6 : vector<1x10xf32>
    %cst_45 = arith.constant 0.000000e+00 : f32
    %124 = vector.broadcast %cst_45 : f32 to vector<1x10xf32>
    %125 = arith.select %121, %123, %124 : vector<1x10xi1>, vector<1x10xf32>
    %126 = arith.mulf %116, %119 : vector<1x10xf32>
    %127 = arith.mulf %126, %125 : vector<1x10xf32>
    %128 = arith.mulf %127, %125 : vector<1x10xf32>
    %c0_46 = arith.constant 0 : index
    %c0_47 = arith.constant 0 : index
    %129 = vector.load %arg3[%c0_46, %c0_47] : memref<1x10xf32, #tpu.memory_space<vmem>>, vector<1x10xf32>
    tpu.vector_store %arg3[%c0_46, %c0_47], %128 {strides = array<i32>} : memref<1x10xf32, #tpu.memory_space<vmem>>, vector<1x10xf32>,
    return
  }
  func.func @transform_0(%arg0: i32) -> (i32, i32, i32) {
    %c0_i32 = arith.constant 0 : i32
    %c0_i32_0 = arith.constant 0 : i32
    %c0_i32_1 = arith.constant 0 : i32
    return %c0_i32, %c0_i32_0, %arg0 : i32, i32, i32
  }
  func.func @transform_1(%arg0: i32) -> (i32, i32) {
    %c0_i32 = arith.constant 0 : i32
    %c0_i32_0 = arith.constant 0 : i32
    return %c0_i32, %arg0 : i32, i32
  }
  func.func @transform_2(%arg0: i32) -> (i32, i32) {
    %c0_i32 = arith.constant 0 : i32
    %c0_i32_0 = arith.constant 0 : i32
    return %c0_i32, %arg0 : i32, i32
  }
}

</mosaic_0001>

<bundles_post_ra>
// kernel: mee_loss.1
= control target key start
LH: loop header
LB: loop body
LE: loop exit
PB: predicated region body
PF: predicated region fallthrough
CT: control target
= control target key end

     0   :  { %7 = vsyncpa [#allocation3], 0  ;;  %s339_s0 = inlined_call_operand.hbm [shape: f32[3,8,10], index: 0, kind: input, shape index: {}]   ;;  %s340_s1 = inlined_call_operand.hbm [shape: f32[8,10], index: 1, kind: input, shape index: {}]   ;;  %s341_s2 = inlined_call_operand.vmem [shape: f32[1,10], index: 2, kind: output, shape index: {}]  }
   0x1   :  { %8 = vsyncpa [#allocation5], 0  ;;  %s248_s9 = smov [#allocation2]   ;;  %s200_s13 = scalar_lea.hbm %s339_s0, 384 }
   0x2   :  { %s14_s10 = sshll.u32 %s248_s9, 4  ;;  %p201_p0 = scmp.ne.s32.totalorder %s339_s0, %s200_s13  ;;  %s15_s10 = int_to_ptr.vmem [resolvable:$true] %s14_s10 }
   0x3   :  { %p204_p1 = scmp.lt.u32.totalorder %s200_s13, %s339_s0 }
   0x5   :  { %p206_p2 = pnand %p204_p1, %p201_p0 }
   0x7   :  { %209 = shalt.err (!%p206_p2)
}
   0x8   :  { %s210_s18 = scalar_lea.vmem %s15_s10, 384  ;;  %p215_p4 = scmp.lt.s32.totalorder %s15_s10, %s15_s10 }
   0x9   :  { %p211_p3 = scmp.ne.s32.totalorder %s15_s10, %s210_s18  ;;  %p216_p5 = scmp.lt.s32.totalorder %s210_s18, %s210_s18 }
   0xb   :  { %p217_p6 = por %p216_p5, %p215_p4 }
   0xd   :  { %p218_p7 = pnand %p217_p6, %p211_p3 }
   0xf   :  { %221 = shalt.err (!%p218_p7)
}
  0x10   :  { %s249_s19 = smov 128   ;;  %s250_s20 = smov 8  }
  0x11   :  { %20 = dma.hbm_to_vmem [thread:$0]  %s339_s0, 384, %s15_s10, [#allocation3], %s249_s19, %s249_s19, %s250_s20  }
  0x12   :  { %s251_s23 = smov [#allocation4]   ;;  %s222_s27 = scalar_lea.hbm %s340_s1, 128 }
  0x13   :  { %s27_s24 = sshll.u32 %s251_s23, 4  ;;  %p223_p8 = scmp.ne.s32.totalorder %s340_s1, %s222_s27  ;;  %s28_s24 = int_to_ptr.vmem [resolvable:$true] %s27_s24 }
  0x14   :  { %p226_p9 = scmp.lt.u32.totalorder %s222_s27, %s340_s1 }
  0x16   :  { %p228_p10 = pnand %p226_p9, %p223_p8 }
  0x18   :  { %231 = shalt.err (!%p228_p10)
}
  0x19   :  { %s232_s4 = scalar_lea.vmem %s28_s24, 128  ;;  %p237_p12 = scmp.lt.s32.totalorder %s28_s24, %s28_s24 }
  0x1a   :  { %p233_p11 = scmp.ne.s32.totalorder %s28_s24, %s232_s4  ;;  %p238_p13 = scmp.lt.s32.totalorder %s232_s4, %s232_s4 }
  0x1c   :  { %p239_p0 = por %p238_p13, %p237_p12 }
  0x1e   :  { %p240_p1 = pnand %p239_p0, %p233_p11 }
  0x20   :  { %243 = shalt.err (!%p240_p1)
}
  0x21   :  { %30 = dma.hbm_to_vmem [thread:$0]  %s340_s1, 128, %s28_s24, [#allocation5]  }
  0x22   :  { %244 = dma.done.wait [#allocation3], 384  }
  0x23   :  { %245 = vsyncadd [#allocation3], 4294966912 }
  0x24   :  { %246 = dma.done.wait [#allocation5], 128  }
  0x25   :  { %247 = vsyncadd [#allocation5], 4294967168  ;;  %v292_v0 = vld [vmem:[#allocation4] sm:$0xff]  ;;  %vm41_vm0 = vcmask 80896   ;;  %v49_v1 = vld [vmem:[#allocation2] sm:$0xff]  ;;  %v252_v4 = vmov 0.0  }
  0x26   :  { %v52_v2 = vld [vmem:[#allocation2 + $0x8] sm:$0xff]  ;;  %vm38_vm1 = vcmp.gt.f32.partialorder %v292_v0, -inf  ;;  %v55_v3 = vld [vmem:[#allocation2 + $0x10] sm:$0xff]  ;;  %vm57_vm2 = vcmp.eq.f32.partialorder %v292_v0, 0.0  ;;  %vm60_vm3 = vcmp.eq.f32.partialorder %v292_v0, 1.0  ;;  %vm63_vm4 = vcmp.eq.f32.partialorder %v292_v0, 2.0 }
  0x27   :  { %v301_v5 = vsel %vm38_vm1, 1.0, %v252_v4  ;;  %v50_v6 = vsel %vm38_vm1, %v49_v1, 0.0  ;;  %v53_v7 = vsel %vm38_vm1, %v52_v2, 0.0  ;;  %v56_v8 = vsel %vm38_vm1, %v55_v3, 0.0 }
  0x28   :  { %v310_v9 = vsel %vm57_vm2, 1.0, %v252_v4  ;;  %v313_v10 = vsel %vm60_vm3, 1.0, %v252_v4  ;;  %v316_v11 = vsel %vm63_vm4, 1.0, %v252_v4  ;;  %v42_v12 = vsel %vm41_vm0, %v301_v5, 0.0 }
  0x29   :  { %v66_v13 = vsel %vm41_vm0, %v310_v9, 0.0  ;;  %v81_v14 = vsel %vm41_vm0, %v313_v10, 0.0  ;;  %v96_v15 = vsel %vm41_vm0, %v316_v11, 0.0  ;;  %v111_v19 = vmax.f32 %v50_v6, %v53_v7 }
  0x2a   :  { %v67_v16 = vrot.slane %v66_v13, 4  ;;  %v82_v17 = vrot.slane %v81_v14, 4  ;;  %v97_v18 = vrot.slane %v96_v15, 4  ;;  %v43_v24 = vrot.slane %v42_v12, 4 }
  0x2b   :  { %v112_v23 = vmax.f32 %v111_v19, %v56_v8  ;;  %v130_v61 = vsel %vm38_vm1, %v292_v0, 0.0  ;;  %vm167_vm12 = vcmask 73728  }
  0x2c   :  { %v68_v20 = vadd.f32 %v67_v16, %v66_v13  ;;  %v83_v21 = vadd.f32 %v82_v17, %v81_v14  ;;  %v98_v22 = vadd.f32 %v97_v18, %v96_v15  ;;  %v44_v35 = vadd.f32 %v43_v24, %v42_v12 }
  0x2d   :  { %v113_v28 = vsub.f32 %v50_v6, %v112_v23  ;;  %v116_v29 = vsub.f32 %v53_v7, %v112_v23  ;;  %v119_v30 = vsub.f32 %v56_v8, %v112_v23  ;;  %vm131_vm9 = vcmp.ne.f32.partialorder %v130_v61, 0.0 }
  0x2e   :  { %v69_v25 = vrot.slane %v68_v20, 2  ;;  %v84_v26 = vrot.slane %v83_v21, 2  ;;  %v99_v27 = vrot.slane %v98_v22, 2  ;;  %v45_v44 = vrot.slane %v44_v35, 2 }
  0x2f   :  { %v114_v34 = vmul.f32 1.442695, %v113_v28  ;;  %v117_v36 = vmul.f32 1.442695, %v116_v29  ;;  %v120_v37 = vmul.f32 1.442695, %v119_v30 }
  0x30   :  { %v70_v31 = vadd.f32 %v69_v25, %v68_v20  ;;  %v85_v32 = vadd.f32 %v84_v26, %v83_v21  ;;  %v100_v33 = vadd.f32 %v99_v27, %v98_v22  ;;  %v46_v50 = vadd.f32 %v45_v44, %v44_v35 }
  0x31   :  { %184 = vpow2.f32 %v114_v34  ;;  %v132_v14 = vadd.f32 1.0, %v130_v61 }
  0x32   :  { %v71_v38 = vrot.slane %v70_v31, 1  ;;  %v86_v39 = vrot.slane %v85_v32, 1  ;;  %v101_v40 = vrot.slane %v100_v33, 1  ;;  %186 = vpow2.f32 %v117_v36 }
  0x33   :  { %188 = vpow2.f32 %v120_v37  ;;  %v47_v54 = vrot.slane %v46_v50, 1  ;;  %v133_v21 = vsel %vm131_vm9, %v132_v14, %v130_v61 }
  0x34   :  { %v72_v41 = vadd.f32 %v71_v38, %v70_v31  ;;  %v87_v42 = vadd.f32 %v86_v39, %v85_v32  ;;  %v102_v43 = vadd.f32 %v101_v40, %v100_v33 }
  0x35   :  { %v48_v58 = vadd.f32 %v47_v54, %v46_v50 }
  0x36   :  { %v74_v45 = vmax.f32 %v72_v41, 1.0  ;;  %v89_v46 = vmax.f32 %v87_v42, 1.0  ;;  %v104_v47 = vmax.f32 %v102_v43, 1.0  ;;  %vm73_vm5 = vcmp.gt.f32.partialorder %v72_v41, 0.0 }
  0x37   :  { %vm88_vm6 = vcmp.gt.f32.partialorder %v87_v42, 0.0  ;;  %vm103_vm8 = vcmp.gt.f32.partialorder %v102_v43, 0.0  ;;  %vm160_vm11 = vcmp.gt.f32.partialorder %v48_v58, 0.0 }
  0x38   :  { %v75_v48 = vmul.f32 3.0, %v74_v45  ;;  %v90_v49 = vmul.f32 3.0, %v89_v46  ;;  %v105_v51 = vmul.f32 3.0, %v104_v47 }
  0x3a   :  { %190 = vrcp.f32 %v75_v48 }
  0x3b   :  { %192 = vrcp.f32 %v90_v49  ;;  %v185_v52 = vpop.eup %184 }
  0x3c   :  { %194 = vrcp.f32 %v105_v51  ;;  %v187_v53 = vpop.eup %186 }
  0x3d   :  { %v189_v55 = vpop.eup %188  ;;  %v122_v56 = vadd.f32 %v187_v53, %v185_v52  ;;  %v124_v60 = vmul.f32 2.0, %v187_v53  ;;  %vm136_vm7 = vcmp.gt.f32.partialorder %v187_v53, %v185_v52  ;;  %v138_v2 = vmax.f32 %v185_v52, %v187_v53 }
  0x3e   :  { %v126_v1 = vmul.f32 3.0, %v189_v55  ;;  %v137_v15 = vsel %vm136_vm7, 1.0, %v252_v4 }
  0x3f   :  { %v123_v57 = vadd.f32 %v189_v55, %v122_v56  ;;  %vm139_vm10 = vcmp.gt.f32.partialorder %v189_v55, %v138_v2 }
  0x40   :  { %v127_v17 = vadd.f32 %v126_v1, %v124_v60  ;;  %v140_v22 = vsel %vm139_vm10, 2.0, %v137_v15 }
  0x41   :  { %196 = vrcp.f32 %v123_v57 }
  0x42   :  { %198 = vrcp.f32 %v48_v58 }
  0x44   :  { %v191_v59 = vpop.eup %190 }
  0x45   :  { %v193_v62 = vpop.eup %192  ;;  %v77_v63 = vmul.f32 %v191_v59, %v48_v58 }
  0x46   :  { %v195_v3 = vpop.eup %194  ;;  %v92_v6 = vmul.f32 %v193_v62, %v48_v58 }
  0x47   :  { %v78_v7 = vsel %vm73_vm5, %v77_v63, 0.0  ;;  %v107_v8 = vmul.f32 %v195_v3, %v48_v58 }
  0x48   :  { %v79_v12 = vmul.f32 %v310_v9, %v78_v7  ;;  %v93_v13 = vsel %vm88_vm6, %v92_v6, 0.0 }
  0x49   :  { %v94_v16 = vmul.f32 %v313_v10, %v93_v13  ;;  %v108_v0 = vsel %vm103_vm8, %v107_v8, 0.0 }
  0x4a   :  { %v109_v18 = vmul.f32 %v316_v11, %v108_v0 }
  0x4b   :  { %v95_v19 = vadd.f32 %v94_v16, %v79_v12  ;;  %v197_v20 = vpop.eup %196 }
  0x4c   :  { %v129_v24 = vmul.f32 %v197_v20, %v127_v17  ;;  %v199_v39 = vpop.eup %198 }
  0x4d   :  { %v110_v23 = vadd.f32 %v109_v18, %v95_v19  ;;  %v163_v43 = vsel %vm160_vm11, %v199_v39, 0.0 }
  0x4e   :  { %v134_v25 = vsub.f32 %v129_v24, %v133_v21  ;;  %v141_v26 = vsub.f32 %v129_v24, %v140_v22 }
  0x4f   :  { %v145_v9 = vsel %vm41_vm0, %v110_v23, 0.0 }
  0x50   :  { %v146_v27 = vrot.slane %v145_v9, 4  ;;  %v135_v28 = vmul.f32 %v134_v25, %v134_v25  ;;  %v142_v4 = vmul.f32 0.5, %v141_v26 }
  0x52   :  { %v147_v29 = vadd.f32 %v146_v27, %v145_v9  ;;  %v143_v10 = vmul.f32 %v142_v4, %v142_v4 }
  0x54   :  { %v144_v30 = vadd.f32 %v143_v10, %v135_v28  ;;  %v148_v31 = vrot.slane %v147_v29, 2 }
  0x56   :  { %v152_v32 = vmul.f32 %v301_v5, %v144_v30  ;;  %v149_v33 = vadd.f32 %v148_v31, %v147_v29 }
  0x58   :  { %v153_v11 = vsel %vm41_vm0, %v152_v32, 0.0  ;;  %v150_v36 = vrot.slane %v149_v33, 1 }
  0x59   :  { %v154_v34 = vrot.slane %v153_v11, 4 }
  0x5a   :  { %v151_v40 = vadd.f32 %v150_v36, %v149_v33 }
  0x5b   :  { %v155_v35 = vadd.f32 %v154_v34, %v153_v11 }
  0x5d   :  { %v156_v37 = vrot.slane %v155_v35, 2 }
  0x5f   :  { %v157_v38 = vadd.f32 %v156_v37, %v155_v35 }
  0x61   :  { %v158_v41 = vrot.slane %v157_v38, 1 }
  0x63   :  { %v159_v42 = vadd.f32 %v158_v41, %v157_v38 }
  0x65   :  { %v164_v44 = vmul.f32 %v159_v42, %v151_v40 }
  0x67   :  { %v165_v45 = vmul.f32 %v164_v44, %v163_v43 }
  0x69   :  { %v166_v46 = vmul.f32 %v165_v45, %v163_v43 }
  0x6b   :  { %168 = vst.msk [vmem:[%s341_s2] sm:$0x1] %vm167_vm12, %v166_v46 }
  0x6c   :  { %173 = vsyncpa [#allocation3], 1 }
  0x6d   :  { %174 = vsyncpa [#allocation5], 1 }

</bundles_post_ra>
